<compile_context>
chip_gen: v5e
topology: v5e:2x2
jax: 0.10.0
libtpu: 0.0.40
codegen_flags: <defaults>
</compile_context>

<pallas_src>
import functools

import jax
import jax.numpy as jnp
from jax.experimental import pallas as pl
from jax.experimental.pallas import tpu as pltpu

LANE = 128


def _pad_to(n, m):
    return ((n + m - 1) // m) * m


# ---------------------------------------------------------------------------
# Parameter construction (deterministic, mimics nn.Linear default init ranges)
# ---------------------------------------------------------------------------
def build_ae_params(architecture, input_dim, key):
    """Returns (weights, biases, relu_flags) matching AEModel's layer order.

    weights[i] has shape (in_dim, out_dim)  (== PyTorch weight.T)."""
    layer_dims = []   # list of (in_dim, out_dim)
    relu_flags = []   # whether ReLU follows that Linear

    # Encoder
    current_dim = input_dim
    for i, next_dim in enumerate(architecture):
        layer_dims.append((current_dim, next_dim))
        if i == len(architecture) - 1:
            relu_flags.append(False)           # last encoder layer: no ReLU
        else:
            relu_flags.append(True)
            current_dim = next_dim

    # Decoder
    current_dim = architecture[-1]
    for next_dim in reversed(architecture[:-1]):
        layer_dims.append((current_dim, next_dim))
        relu_flags.append(True)
        current_dim = next_dim
    layer_dims.append((current_dim, input_dim))  # final decoder layer: no ReLU
    relu_flags.append(False)

    weights, biases = [], []
    for din, dout in layer_dims:
        kw, kb, key = jax.random.split(key, 3)
        bound = 1.0 / jnp.sqrt(jnp.float32(din))
        w = jax.random.uniform(kw, (din, dout), jnp.float32, -bound, bound)
        b = jax.random.uniform(kb, (1, dout), jnp.float32, -bound, bound)
        weights.append(w)
        biases.append(b)

    return weights, biases, tuple(relu_flags)


# ---------------------------------------------------------------------------
# Algebraic folding of Linear layers that are NOT separated by a ReLU.
# For AEModel this merges encoder-last (d->latent) with decoder-first
# (latent->d) into a single d->d layer.  Done in f32 BEFORE the bf16 cast.
# ---------------------------------------------------------------------------
def fold_linear_chain(weights, biases, relu_flags):
    fw, fb, fr = [], [], []
    i, L = 0, len(weights)
    while i < L:
        w = weights[i].astype(jnp.float32)
        b = biases[i].astype(jnp.float32)
        r = relu_flags[i]
        while (not r) and (i + 1 < L):
            w2 = weights[i + 1].astype(jnp.float32)
            b2 = biases[i + 1].astype(jnp.float32)
            w = w @ w2
            b = b @ w2 + b2
            r = relu_flags[i + 1]
            i += 1
        fw.append(w)
        fb.append(b)
        fr.append(bool(r))
        i += 1
    return fw, fb, tuple(fr)


# ---------------------------------------------------------------------------
# Fused MLP kernel: every (folded) Linear (+ optional ReLU) runs inside one
# Pallas kernel body on the MXU/VPU for one (TB, input_dim) batch tile.
# ---------------------------------------------------------------------------
def ae_mlp_kernel(relu_flags, x_ref, *refs):
    # refs = (w0, b0, w1, b1, ..., w_{L-1}, b_{L-1}, out_ref)
    out_ref = refs[-1]
    param_refs = refs[:-1]
    n_layers = len(param_refs) // 2

    h = x_ref[...]                                   # bf16 activation tile
    # Static Python loop (fully unrolled -> full LLO scheduler visibility).
    for li in range(n_layers):
        w = param_refs[2 * li][...]                  # bf16 weights (pre-cast)
        b = param_refs[2 * li + 1][...]              # f32 bias (1, dout)
        hm = h if h.dtype == w.dtype else h.astype(w.dtype)
        # bf16 MXU operands, f32 accumulation; bias add + ReLU in f32 (VPU).
        h = jnp.dot(hm, w, preferred_element_type=jnp.float32) + b
        if relu_flags[li]:
            h = jnp.maximum(h, 0.0)
    out_ref[...] = h.astype(out_ref.dtype)


def _choose_block_batch(batch, block_batch):
    """Pick a batch-tile size: amortize step overhead for big batches,
    try to produce >=2 tiles (v7x megacore) for medium batches."""
    block_batch = max(8, _pad_to(block_batch, 8))
    batch8 = _pad_to(batch, 8)
    if batch8 <= block_batch:
        if batch8 >= 16:
            return _pad_to((batch8 + 1) // 2, 8)   # 2 tiles
        return batch8                              # tiny: single tile
    return block_batch


def ae_forward(x, weights, biases, relu_flags, *,
               block_batch=512, mxu_dtype=jnp.bfloat16):
    batch, input_dim = x.shape

    # ---- fold no-ReLU adjacent layers in f32 ----
    fweights, fbiases, frelu = fold_linear_chain(weights, biases, relu_flags)
    n_layers = len(fweights)

    # ---- pad only INTERNAL feature dims to 128 lanes (zero pad, no leak) ----
    # First layer keeps K = input_dim (matches the narrow x block); last layer
    # keeps N = input_dim (matches the narrow output block).
    padded_w, padded_b = [], []
    for li, (w, b) in enumerate(zip(fweights, fbiases)):
        din, dout = w.shape
        din_p = din if li == 0 else _pad_to(din, LANE)
        dout_p = dout if li == n_layers - 1 else _pad_to(dout, LANE)
        wp = jnp.zeros((din_p, dout_p), jnp.float32).at[:din, :dout].set(w)
        bp = jnp.zeros((1, dout_p), jnp.float32).at[:, :dout].set(b)
        padded_w.append(wp.astype(mxu_dtype))        # MXU operand dtype
        padded_b.append(bp)                          # bias stays f32

    out_dim = padded_w[-1].shape[1]                  # == input_dim

    # ---- pad x along batch only; store as bf16 (halves input HBM bytes) ----
    tb = _choose_block_batch(batch, block_batch)
    batch_p = _pad_to(batch, tb)
    xp = (jnp.zeros((batch_p, input_dim), mxu_dtype)
          .at[:batch, :].set(x.astype(mxu_dtype)))

    flat_params = []
    for w, b in zip(padded_w, padded_b):
        flat_params.append(w)
        flat_params.append(b)

    grid = (batch_p // tb,)

    # x / out: tiled along batch (double-buffered).  Last block dim equals the
    # full array dim, so the narrow (input_dim-lane) blocks are legal.
    x_spec = pl.BlockSpec((tb, input_dim), lambda i: (i, 0))
    out_spec = pl.BlockSpec((tb, out_dim), lambda i: (i, 0))
    # Params: constant index_map -> fetched once, VMEM-resident across tiles.
    param_specs = [pl.BlockSpec(p.shape, lambda i: (0, 0)) for p in flat_params]

    flops = 2 * batch_p * sum(w.shape[0] * w.shape[1] for w in padded_w)
    bytes_accessed = (int(xp.nbytes) + batch_p * out_dim * 4
                      + sum(int(p.nbytes) for p in flat_params))
    cost = pl.CostEstimate(flops=flops, transcendentals=0,
                           bytes_accessed=bytes_accessed)

    kernel = functools.partial(ae_mlp_kernel, frelu)

    out_p = pl.pallas_call(
        kernel,
        out_shape=jax.ShapeDtypeStruct((batch_p, out_dim), jnp.float32),
        grid=grid,
        in_specs=[x_spec] + param_specs,
        out_specs=out_spec,
        compiler_params=pltpu.CompilerParams(
            dimension_semantics=("parallel",),       # shard batch tiles over TCs
            vmem_limit_bytes=32 * 1024 * 1024,       # explicit; safe on v5e..v7x
        ),
        cost_estimate=cost,
    )(xp, *flat_params)

    # Strip batch padding (feature dim is already the real one).
    return out_p[:batch, :].astype(x.dtype)


# ---------------------------------------------------------------------------
# Pure-JAX f32 reference for correctness checking (matches PyTorch AEModel,
# uses the UNfolded layer list).
# ---------------------------------------------------------------------------
def ae_forward_ref(x, weights, biases, relu_flags):
    h = x
    for w, b, r in zip(weights, biases, relu_flags):
        h = h @ w + b
        if r:
            h = jnp.maximum(h, 0.0)
    return h


if __name__ == "__main__":
    key = jax.random.PRNGKey(0)
    kx, kx2, kp = jax.random.split(key, 3)

    # Small shapes consistent with the module: MLP autoencoder on flat features.
    batch = 8
    input_dim = 16
    architecture = [32, 32, 8]   # encoder: 16->32->32->8 ; decoder: 8->32->32->16

    weights, biases, relu_flags = build_ae_params(architecture, input_dim, kp)

    # --- check 1: tiny batch (single grid tile, exercises batch padding) ---
    x = jax.random.normal(kx, (batch, input_dim), jnp.float32)
    out = jax.block_until_ready(ae_forward(x, weights, biases, relu_flags))
    ref = ae_forward_ref(x, weights, biases, relu_flags)
    assert out.shape == (batch, input_dim)
    # bf16 MXU operands (f32 accumulation) + folded layer -> loosened tolerance.
    assert jnp.allclose(out, ref, atol=3e-2, rtol=3e-2), \
        "mismatch vs reference (small batch)"

    # --- check 2: ragged multi-tile batch (exercises the batch grid / megacore) ---
    batch2 = 200                                  # -> 2 grid tiles of 104 rows
    x2 = jax.random.normal(kx2, (batch2, input_dim), jnp.float32)
    out2 = jax.block_until_ready(ae_forward(x2, weights, biases, relu_flags))
    ref2 = ae_forward_ref(x2, weights, biases, relu_flags)
    assert out2.shape == (batch2, input_dim)
    assert jnp.allclose(out2, ref2, atol=3e-2, rtol=3e-2), \
        "mismatch vs reference (multi-tile)"

    print("KERNEL_OK")
</pallas_src>

<mosaic_0001>
module attributes {stable_mosaic.version = 11 : i64} {
  func.func @ae_mlp_kernel(%arg0: i32, %arg1: memref<8x16xbf16, #tpu.memory_space<vmem>>, %arg2: memref<16x128xbf16, #tpu.memory_space<vmem>>, %arg3: memref<1x128xf32, #tpu.memory_space<vmem>>, %arg4: memref<128x128xbf16, #tpu.memory_space<vmem>>, %arg5: memref<1x128xf32, #tpu.memory_space<vmem>>, %arg6: memref<128x128xbf16, #tpu.memory_space<vmem>>, %arg7: memref<1x128xf32, #tpu.memory_space<vmem>>, %arg8: memref<128x128xbf16, #tpu.memory_space<vmem>>, %arg9: memref<1x128xf32, #tpu.memory_space<vmem>>, %arg10: memref<128x16xbf16, #tpu.memory_space<vmem>>, %arg11: memref<1x16xf32, #tpu.memory_space<vmem>>, %arg12: memref<8x16xf32, #tpu.memory_space<vmem>>) attributes {dimension_semantics = [#tpu.dimension_semantics<parallel>], iteration_bounds = array<i64: 1>, scalar_prefetch = 0 : i64, scratch_operands = 0 : i64, tpu.core_type = #tpu.core_type<tc>, window_params = [{transform_indices = @transform_0, window_bounds = array<i64: 8, 16>}, {pipeline_mode = #tpu.pipeline_mode<synchronous>, transform_indices = @transform_1, window_bounds = array<i64: 16, 128>}, {pipeline_mode = #tpu.pipeline_mode<synchronous>, transform_indices = @transform_2, window_bounds = array<i64: 1, 128>}, {pipeline_mode = #tpu.pipeline_mode<synchronous>, transform_indices = @transform_3, window_bounds = array<i64: 128, 128>}, {pipeline_mode = #tpu.pipeline_mode<synchronous>, transform_indices = @transform_4, window_bounds = array<i64: 1, 128>}, {pipeline_mode = #tpu.pipeline_mode<synchronous>, transform_indices = @transform_5, window_bounds = array<i64: 128, 128>}, {pipeline_mode = #tpu.pipeline_mode<synchronous>, transform_indices = @transform_6, window_bounds = array<i64: 1, 128>}, {pipeline_mode = #tpu.pipeline_mode<synchronous>, transform_indices = @transform_7, window_bounds = array<i64: 128, 128>}, {pipeline_mode = #tpu.pipeline_mode<synchronous>, transform_indices = @transform_8, window_bounds = array<i64: 1, 128>}, {pipeline_mode = #tpu.pipeline_mode<synchronous>, transform_indices = @transform_9, window_bounds = array<i64: 128, 16>}, {pipeline_mode = #tpu.pipeline_mode<synchronous>, transform_indices = @transform_10, window_bounds = array<i64: 1, 16>}, {transform_indices = @transform_11, window_bounds = array<i64: 8, 16>}]} {
    %c0 = arith.constant 0 : index
    %c0_0 = arith.constant 0 : index
    %0 = vector.load %arg1[%c0, %c0_0] : memref<8x16xbf16, #tpu.memory_space<vmem>>, vector<8x16xbf16>
    %c0_1 = arith.constant 0 : index
    %c0_2 = arith.constant 0 : index
    %1 = vector.load %arg2[%c0_1, %c0_2] : memref<16x128xbf16, #tpu.memory_space<vmem>>, vector<16x128xbf16>
    %c0_3 = arith.constant 0 : index
    %c0_4 = arith.constant 0 : index
    %2 = vector.load %arg3[%c0_3, %c0_4] : memref<1x128xf32, #tpu.memory_space<vmem>>, vector<1x128xf32>
    %cst = arith.constant dense<0.000000e+00> : vector<8x128xf32>
    %3 = tpu.matmul %0, %1, %cst {dimension_numbers = #tpu.dot_dimension_numbers<[1], [0], [0], [1], [0, 0, 1, 1], [], []>} : vector<8x16xbf16>, vector<16x128xbf16>, vector<8x128xf32> -> vector<8x128xf32>
    %4 = vector.broadcast %2 : vector<1x128xf32> to vector<8x128xf32>
    %5 = arith.addf %3, %4 : vector<8x128xf32>
    %cst_5 = arith.constant 0.000000e+00 : f32
    %6 = vector.broadcast %cst_5 : f32 to vector<8x128xf32>
    %7 = arith.maximumf %5, %6 : vector<8x128xf32>
    %c0_6 = arith.constant 0 : index
    %c0_7 = arith.constant 0 : index
    %8 = vector.load %arg4[%c0_6, %c0_7] : memref<128x128xbf16, #tpu.memory_space<vmem>>, vector<128x128xbf16>
    %c0_8 = arith.constant 0 : index
    %c0_9 = arith.constant 0 : index
    %9 = vector.load %arg5[%c0_8, %c0_9] : memref<1x128xf32, #tpu.memory_space<vmem>>, vector<1x128xf32>
    %10 = arith.truncf %7 : vector<8x128xf32> to vector<8x128xbf16>
    %cst_10 = arith.constant dense<0.000000e+00> : vector<8x128xf32>
    %11 = tpu.matmul %10, %8, %cst_10 {dimension_numbers = #tpu.dot_dimension_numbers<[1], [0], [0], [1], [0, 0, 1, 1], [], []>} : vector<8x128xbf16>, vector<128x128xbf16>, vector<8x128xf32> -> vector<8x128xf32>
    %12 = vector.broadcast %9 : vector<1x128xf32> to vector<8x128xf32>
    %13 = arith.addf %11, %12 : vector<8x128xf32>
    %cst_11 = arith.constant 0.000000e+00 : f32
    %14 = vector.broadcast %cst_11 : f32 to vector<8x128xf32>
    %15 = arith.maximumf %13, %14 : vector<8x128xf32>
    %c0_12 = arith.constant 0 : index
    %c0_13 = arith.constant 0 : index
    %16 = vector.load %arg6[%c0_12, %c0_13] : memref<128x128xbf16, #tpu.memory_space<vmem>>, vector<128x128xbf16>
    %c0_14 = arith.constant 0 : index
    %c0_15 = arith.constant 0 : index
    %17 = vector.load %arg7[%c0_14, %c0_15] : memref<1x128xf32, #tpu.memory_space<vmem>>, vector<1x128xf32>
    %18 = arith.truncf %15 : vector<8x128xf32> to vector<8x128xbf16>
    %cst_16 = arith.constant dense<0.000000e+00> : vector<8x128xf32>
    %19 = tpu.matmul %18, %16, %cst_16 {dimension_numbers = #tpu.dot_dimension_numbers<[1], [0], [0], [1], [0, 0, 1, 1], [], []>} : vector<8x128xbf16>, vector<128x128xbf16>, vector<8x128xf32> -> vector<8x128xf32>
    %20 = vector.broadcast %17 : vector<1x128xf32> to vector<8x128xf32>
    %21 = arith.addf %19, %20 : vector<8x128xf32>
    %cst_17 = arith.constant 0.000000e+00 : f32
    %22 = vector.broadcast %cst_17 : f32 to vector<8x128xf32>
    %23 = arith.maximumf %21, %22 : vector<8x128xf32>
    %c0_18 = arith.constant 0 : index
    %c0_19 = arith.constant 0 : index
    %24 = vector.load %arg8[%c0_18, %c0_19] : memref<128x128xbf16, #tpu.memory_space<vmem>>, vector<128x128xbf16>
    %c0_20 = arith.constant 0 : index
    %c0_21 = arith.constant 0 : index
    %25 = vector.load %arg9[%c0_20, %c0_21] : memref<1x128xf32, #tpu.memory_space<vmem>>, vector<1x128xf32>
    %26 = arith.truncf %23 : vector<8x128xf32> to vector<8x128xbf16>
    %cst_22 = arith.constant dense<0.000000e+00> : vector<8x128xf32>
    %27 = tpu.matmul %26, %24, %cst_22 {dimension_numbers = #tpu.dot_dimension_numbers<[1], [0], [0], [1], [0, 0, 1, 1], [], []>} : vector<8x128xbf16>, vector<128x128xbf16>, vector<8x128xf32> -> vector<8x128xf32>
    %28 = vector.broadcast %25 : vector<1x128xf32> to vector<8x128xf32>
    %29 = arith.addf %27, %28 : vector<8x128xf32>
    %cst_23 = arith.constant 0.000000e+00 : f32
    %30 = vector.broadcast %cst_23 : f32 to vector<8x128xf32>
    %31 = arith.maximumf %29, %30 : vector<8x128xf32>
    %c0_24 = arith.constant 0 : index
    %c0_25 = arith.constant 0 : index
    %32 = vector.load %arg10[%c0_24, %c0_25] : memref<128x16xbf16, #tpu.memory_space<vmem>>, vector<128x16xbf16>
    %c0_26 = arith.constant 0 : index
    %c0_27 = arith.constant 0 : index
    %33 = vector.load %arg11[%c0_26, %c0_27] : memref<1x16xf32, #tpu.memory_space<vmem>>, vector<1x16xf32>
    %34 = arith.truncf %31 : vector<8x128xf32> to vector<8x128xbf16>
    %cst_28 = arith.constant dense<0.000000e+00> : vector<8x16xf32>
    %35 = tpu.matmul %34, %32, %cst_28 {dimension_numbers = #tpu.dot_dimension_numbers<[1], [0], [0], [1], [0, 0, 1, 1], [], []>} : vector<8x128xbf16>, vector<128x16xbf16>, vector<8x16xf32> -> vector<8x16xf32>
    %36 = vector.broadcast %33 : vector<1x16xf32> to vector<8x16xf32>
    %37 = arith.addf %35, %36 : vector<8x16xf32>
    %c0_29 = arith.constant 0 : index
    %c0_30 = arith.constant 0 : index
    %38 = vector.load %arg12[%c0_29, %c0_30] : memref<8x16xf32, #tpu.memory_space<vmem>>, vector<8x16xf32>
    tpu.vector_store %arg12[%c0_29, %c0_30], %37 {strides = array<i32>} : memref<8x16xf32, #tpu.memory_space<vmem>>, vector<8x16xf32>,
    return
  }
  func.func @transform_0(%arg0: i32) -> (i32, i32) {
    %c0_i32 = arith.constant 0 : i32
    %c0_i32_0 = arith.constant 0 : i32
    return %arg0, %c0_i32 : i32, i32
  }
  func.func @transform_1(%arg0: i32) -> (i32, i32) {
    %c0_i32 = arith.constant 0 : i32
    %c0_i32_0 = arith.constant 0 : i32
    %c0_i32_1 = arith.constant 0 : i32
    return %c0_i32, %c0_i32_0 : i32, i32
  }
  func.func @transform_2(%arg0: i32) -> (i32, i32) {
    %c0_i32 = arith.constant 0 : i32
    %c0_i32_0 = arith.constant 0 : i32
    %c0_i32_1 = arith.constant 0 : i32
    return %c0_i32, %c0_i32_0 : i32, i32
  }
  func.func @transform_3(%arg0: i32) -> (i32, i32) {
    %c0_i32 = arith.constant 0 : i32
    %c0_i32_0 = arith.constant 0 : i32
    %c0_i32_1 = arith.constant 0 : i32
    return %c0_i32, %c0_i32_0 : i32, i32
  }
  func.func @transform_4(%arg0: i32) -> (i32, i32) {
    %c0_i32 = arith.constant 0 : i32
    %c0_i32_0 = arith.constant 0 : i32
    %c0_i32_1 = arith.constant 0 : i32
    return %c0_i32, %c0_i32_0 : i32, i32
  }
  func.func @transform_5(%arg0: i32) -> (i32, i32) {
    %c0_i32 = arith.constant 0 : i32
    %c0_i32_0 = arith.constant 0 : i32
    %c0_i32_1 = arith.constant 0 : i32
    return %c0_i32, %c0_i32_0 : i32, i32
  }
  func.func @transform_6(%arg0: i32) -> (i32, i32) {
    %c0_i32 = arith.constant 0 : i32
    %c0_i32_0 = arith.constant 0 : i32
    %c0_i32_1 = arith.constant 0 : i32
    return %c0_i32, %c0_i32_0 : i32, i32
  }
  func.func @transform_7(%arg0: i32) -> (i32, i32) {
    %c0_i32 = arith.constant 0 : i32
    %c0_i32_0 = arith.constant 0 : i32
    %c0_i32_1 = arith.constant 0 : i32
    return %c0_i32, %c0_i32_0 : i32, i32
  }
  func.func @transform_8(%arg0: i32) -> (i32, i32) {
    %c0_i32 = arith.constant 0 : i32
    %c0_i32_0 = arith.constant 0 : i32
    %c0_i32_1 = arith.constant 0 : i32
    return %c0_i32, %c0_i32_0 : i32, i32
  }
  func.func @transform_9(%arg0: i32) -> (i32, i32) {
    %c0_i32 = arith.constant 0 : i32
    %c0_i32_0 = arith.constant 0 : i32
    %c0_i32_1 = arith.constant 0 : i32
    return %c0_i32, %c0_i32_0 : i32, i32
  }
  func.func @transform_10(%arg0: i32) -> (i32, i32) {
    %c0_i32 = arith.constant 0 : i32
    %c0_i32_0 = arith.constant 0 : i32
    %c0_i32_1 = arith.constant 0 : i32
    return %c0_i32, %c0_i32_0 : i32, i32
  }
  func.func @transform_11(%arg0: i32) -> (i32, i32) {
    %c0_i32 = arith.constant 0 : i32
    %c0_i32_0 = arith.constant 0 : i32
    return %arg0, %c0_i32 : i32, i32
  }
}

</mosaic_0001>

<bundles_post_ra>
// kernel: tpu_custom_call.1
= control target key start
LH: loop header
LB: loop body
LE: loop exit
PB: predicated region body
PF: predicated region fallthrough
CT: control target
= control target key end

     0   :  { %16 = vsyncpa [#allocation3], 0  ;;  %s1055_s0 = inlined_call_operand.hbm [shape: bf16[8,16], index: 0, kind: input, shape index: {}]   ;;  %s1056_s1 = inlined_call_operand.vmem [shape: bf16[16,128], index: 1, kind: input, shape index: {}]   ;;  %s1057_s2 = inlined_call_operand.hbm [shape: f32[1,128], index: 2, kind: input, shape index: {}]   ;;  %s1058_s3 = inlined_call_operand.vmem [shape: bf16[128,128], index: 3, kind: input, shape index: {}]   ;;  %s1059_s4 = inlined_call_operand.hbm [shape: f32[1,128], index: 4, kind: input, shape index: {}]   ;;  %s1060_s5 = inlined_call_operand.hbm [shape: bf16[128,128], index: 5, kind: input, shape index: {}]   ;;  %s1061_s6 = inlined_call_operand.hbm [shape: f32[1,128], index: 6, kind: input, shape index: {}]   ;;  %s1062_s7 = inlined_call_operand.hbm [shape: bf16[128,128], index: 7, kind: input, shape index: {}]   ;;  %s1063_s8 = inlined_call_operand.hbm [shape: f32[1,128], index: 8, kind: input, shape index: {}]   ;;  %s1064_s9 = inlined_call_operand.vmem [shape: bf16[128,16], index: 9, kind: input, shape index: {}]   ;;  %s1065_s10 = inlined_call_operand.vmem [shape: f32[1,16], index: 10, kind: input, shape index: {}]   ;;  %s1066_s11 = inlined_call_operand.hbm [shape: f32[8,16], index: 11, kind: output, shape index: {}]  }
   0x1   :  { %17 = vsyncpa [#allocation6], 0 }
   0x2   :  { %18 = vsyncpa [#allocation9], 0 }
   0x3   :  { %19 = vsyncpa [#allocation12], 0  ;;  %s39_s19 = sshll.u32 %s1057_s2, 4  ;;  %s40_s19 = int_to_ptr.hbm [resolvable:$true] %s39_s19 }
   0x4   :  { %20 = vsyncpa [#allocation4], 0  ;;  %s905_s20 = smov [#allocation5]   ;;  %s62_s24 = sshll.u32 %s1060_s5, 4  ;;  %s63_s24 = int_to_ptr.hbm [resolvable:$true] %s62_s24 }
   0x5   :  { %s41_s21 = sshll.u32 %s905_s20, 4  ;;  %s906_s25 = smov [#allocation8]   ;;  %s42_s21 = int_to_ptr.vmem [resolvable:$true] %s41_s21 }
   0x6   :  { %44 = dma.hbm_to_vmem [thread:$0]  %s40_s19, 16, %s42_s21, [#allocation6]  }
   0x7   :  { %s64_s26 = sshll.u32 %s906_s25, 4  ;;  %s907_s27 = smov 64   ;;  %s65_s26 = int_to_ptr.vmem [resolvable:$true] %s64_s26 }
   0x8   :  { %s908_s28 = smov 4   ;;  %s86_s2 = sshll.u32 %s1062_s7, 4  ;;  %s87_s2 = int_to_ptr.hbm [resolvable:$true] %s86_s2 }
   0x9   :  { %70 = dma.hbm_to_vmem [thread:$0]  %s63_s24, 1024, %s65_s26, [#allocation9], %s907_s27, %s907_s27, %s908_s28  }
   0xa   :  { %s909_s12 = smov [#allocation11]   ;;  %s26_s5 = sshll.u32 %s1055_s0, 4  ;;  %s27_s5 = int_to_ptr.hbm [resolvable:$true] %s26_s5 }
   0xb   :  { %s88_s13 = sshll.u32 %s909_s12, 4  ;;  %s910_s16 = smov [#allocation2]   ;;  %s89_s13 = int_to_ptr.vmem [resolvable:$true] %s88_s13 }
   0xc   :  { %94 = dma.hbm_to_vmem [thread:$0]  %s87_s2, 1024, %s89_s13, [#allocation12], %s907_s27, %s907_s27, %s908_s28  }
   0xd   :  { %s28_s17 = sshll.u32 %s910_s16, 4  ;;  %s52_s20 = sshll.u32 %s1059_s4, 4  ;;  %s29_s17 = int_to_ptr.vmem [resolvable:$true] %s28_s17  ;;  %s53_s20 = int_to_ptr.hbm [resolvable:$true] %s52_s20 }
   0xe   :  { %31 = dma.hbm_to_vmem [thread:$0]  %s27_s5, 64, %s29_s17, [#allocation3]  }
   0xf   :  { %s76_s22 = sshll.u32 %s1061_s6, 4  ;;  %s911_s23 = smov [#allocation7]   ;;  %s77_s22 = int_to_ptr.hbm [resolvable:$true] %s76_s22 }
  0x10   :  { %s54_s24 = sshll.u32 %s911_s23, 4  ;;  %s912_s0 = smov [#allocation10]   ;;  %s55_s24 = int_to_ptr.vmem [resolvable:$true] %s54_s24 }
  0x11   :  { %57 = dma.hbm_to_vmem [thread:$0]  %s53_s20, 16, %s55_s24, [#allocation6]  }
  0x12   :  { %s78_s25 = sshll.u32 %s912_s0, 4  ;;  %s100_s28 = sshll.u32 %s1063_s8, 4  ;;  %s79_s25 = int_to_ptr.vmem [resolvable:$true] %s78_s25  ;;  %s101_s28 = int_to_ptr.hbm [resolvable:$true] %s100_s28 }
  0x13   :  { %81 = dma.hbm_to_vmem [thread:$0]  %s77_s22, 16, %s79_s25, [#allocation9]  }
  0x14   :  { %s913_s4 = smov [#allocation13]  }
  0x15   :  { %s102_s29 = sshll.u32 %s913_s4, 4  ;;  %s103_s29 = int_to_ptr.vmem [resolvable:$true] %s102_s29 }
  0x16   :  { %105 = dma.hbm_to_vmem [thread:$0]  %s101_s28, 16, %s103_s29, [#allocation12]  }
  0x17   :  { %895 = dma.done.wait [#allocation3], 64  }
  0x18   :  { %896 = vsyncadd [#allocation3], 4294967232 }
  0x19   :  { %897 = dma.done.wait [#allocation6], 32  }
  0x1a   :  { %898 = vsyncadd [#allocation6], 4294967264 }
  0x1b   :  { %899 = dma.done.wait [#allocation9], 1040  }
  0x1c   :  { %900 = vsyncadd [#allocation9], 4294966256 }
  0x1d   :  { %901 = dma.done.wait [#allocation12], 1040  }
  0x1e   :  { %902 = vsyncadd [#allocation12], 4294966256  ;;  %v655_v0 = vld [vmem:[%s1056_s1] sm:$0xff]  ;;  %v663_v1 = vld [vmem:[%s1058_s3 + $0x38] sm:$0xff]  ;;  %vm152_vm0 = vcmask 130048   ;;  %s914_s1 = smov [#allocation14]  }
  0x1f   :  { %163 = vmatpush.bf16.msra.mxu0 %v655_v0  ;;  %v139_v2 = vld [vmem:[#allocation2] sm:$0xf]  ;;  %239 = vmatpush.bf16.msra.mxu1 %v663_v1  ;;  %v662_v3 = vld [vmem:[%s1058_s3 + $0x30] sm:$0xff]  ;;  %v661_v4 = vld [vmem:[%s1058_s3 + $0x28] sm:$0xff]  ;;  %s507_s5 = sshll.u32 %s914_s1, 4  ;;  %s509_s18 = sshll.u32 %s1066_s11, 4  ;;  %s508_s5 = int_to_ptr.vmem [resolvable:$true] %s507_s5  ;;  %s510_s18 = int_to_ptr.hbm [resolvable:$true] %s509_s18 }
  0x20   :  { %v660_v5 = vld [vmem:[%s1058_s3 + $0x20] sm:$0xff]  ;;  %v659_v6 = vld [vmem:[%s1058_s3 + $0x18] sm:$0xff]  ;;  %v658_v7 = vld [vmem:[%s1058_s3 + $0x10] sm:$0xff] }
  0x21   :  { %v657_v8 = vld [vmem:[%s1058_s3 + $0x8] sm:$0xff]  ;;  %v656_v9 = vld [vmem:[%s1058_s3] sm:$0xff]  ;;  %v670_v11 = vld [vmem:[#allocation8 + $0x30] sm:$0xff] }
  0x22   :  { %526 = vmatmul.msk.bf16.vlgmr.msra.gmra.mxu0 %vm152_vm0, %v139_v2  ;;  %v671_v10 = vld [vmem:[#allocation8 + $0x38] sm:$0xff]  ;;  %v669_v12 = vld [vmem:[#allocation8 + $0x28] sm:$0xff]  ;;  %v668_v13 = vld [vmem:[#allocation8 + $0x20] sm:$0xff] }
  0x23   :  { %240 = vmatpush.bf16.msra.mxu1 %v662_v3  ;;  %322 = vmatpush.bf16.msra.mxu2 %v671_v10  ;;  %v667_v14 = vld [vmem:[#allocation8 + $0x18] sm:$0xff]  ;;  %v666_v15 = vld [vmem:[#allocation8 + $0x10] sm:$0xff]  ;;  %v665_v22 = vld [vmem:[#allocation8 + $0x8] sm:$0xff] }
  0x24   :  { %v698_v16 = vld [vmem:[#allocation5] ss:$0 sm:$0xff]  ;;  %v664_v23 = vld [vmem:[#allocation8] sm:$0xff]  ;;  %v678_v25 = vld [vmem:[#allocation11 + $0x30] sm:$0xff] }
  0x25   :  { %v679_v24 = vld [vmem:[#allocation11 + $0x38] sm:$0xff]  ;;  %v677_v26 = vld [vmem:[#allocation11 + $0x28] sm:$0xff]  ;;  %v676_v27 = vld [vmem:[#allocation11 + $0x20] sm:$0xff] }
  0x26   :  { %405 = vmatpush.bf16.msra.mxu3 %v679_v24  ;;  %v675_v28 = vld [vmem:[#allocation11 + $0x18] sm:$0xff]  ;;  %v674_v29 = vld [vmem:[#allocation11 + $0x10] sm:$0xff]  ;;  %v673_v36 = vld [vmem:[#allocation11 + $0x8] sm:$0xff] }
  0x27   :  { %241 = vmatpush.bf16.msra.mxu1 %v661_v4  ;;  %323 = vmatpush.bf16.msra.mxu2 %v670_v11  ;;  %v699_v30 = vld [vmem:[#allocation7] ss:$0 sm:$0xff]  ;;  %v672_v37 = vld [vmem:[#allocation11] sm:$0xff]  ;;  %v687_v38 = vld [vmem:[%s1064_s9 + $0x38] sm:$0xff] }
  0x28   :  { %488 = vmatpush.bf16.msrb.mxu0 %v687_v38  ;;  %v686_v39 = vld [vmem:[%s1064_s9 + $0x30] sm:$0xff]  ;;  %v685_v40 = vld [vmem:[%s1064_s9 + $0x28] sm:$0xff]  ;;  %v684_v41 = vld [vmem:[%s1064_s9 + $0x20] sm:$0xff] }
  0x29   :  { %v683_v42 = vld [vmem:[%s1064_s9 + $0x18] sm:$0xff]  ;;  %v682_v43 = vld [vmem:[%s1064_s9 + $0x10] sm:$0xff]  ;;  %v700_v44 = vld [vmem:[#allocation10] ss:$0 sm:$0xff] }
  0x2a   :  { %406 = vmatpush.bf16.msra.mxu3 %v678_v25  ;;  %v681_v50 = vld [vmem:[%s1064_s9 + $0x8] sm:$0xff]  ;;  %v680_v51 = vld [vmem:[%s1064_s9] sm:$0xff] }
  0x2b   :  { %242 = vmatpush.bf16.msra.mxu1 %v660_v5  ;;  %324 = vmatpush.bf16.msra.mxu2 %v669_v12  ;;  %v701_v52 = vld [vmem:[#allocation13] ss:$0 sm:$0xff]  ;;  %v702_v58 = vld [vmem:[%s1065_s10] ss:$0 sm:$0xff] }
  0x2c   :  { %489 = vmatpush.bf16.msrb.mxu0 %v686_v39 }
  0x2e   :  { %407 = vmatpush.bf16.msra.mxu3 %v677_v26 }
  0x2f   :  { %243 = vmatpush.bf16.msra.mxu1 %v659_v6  ;;  %325 = vmatpush.bf16.msra.mxu2 %v668_v13 }
  0x30   :  { %490 = vmatpush.bf16.msrb.mxu0 %v685_v40 }
  0x32   :  { %408 = vmatpush.bf16.msra.mxu3 %v676_v27 }
  0x33   :  { %244 = vmatpush.bf16.msra.mxu1 %v658_v7  ;;  %326 = vmatpush.bf16.msra.mxu2 %v667_v14 }
  0x34   :  { %491 = vmatpush.bf16.msrb.mxu0 %v684_v41 }
  0x36   :  { %409 = vmatpush.bf16.msra.mxu3 %v675_v28 }
  0x37   :  { %245 = vmatpush.bf16.msra.mxu1 %v657_v8  ;;  %327 = vmatpush.bf16.msra.mxu2 %v666_v15 }
  0x38   :  { %492 = vmatpush.bf16.msrb.mxu0 %v683_v42 }
  0x3a   :  { %410 = vmatpush.bf16.msra.mxu3 %v674_v29 }
  0x3b   :  { %246 = vmatpush.bf16.msra.mxu1 %v656_v9  ;;  %328 = vmatpush.bf16.msra.mxu2 %v665_v22 }
  0x3c   :  { %493 = vmatpush.bf16.msrb.mxu0 %v682_v43 }
  0x3e   :  { %411 = vmatpush.bf16.msra.mxu3 %v673_v36 }
  0x3f   :  { %329 = vmatpush.bf16.msra.mxu2 %v664_v23 }
  0x40   :  { %494 = vmatpush.bf16.msrb.mxu0 %v681_v50 }
  0x42   :  { %412 = vmatpush.bf16.msra.mxu3 %v672_v37 }
  0x44   :  { %495 = vmatpush.bf16.msrb.mxu0 %v680_v51 }
  0x9f   :  { %v165_v17 = vpop.f32.mrf.mxu0 }
  0xa0   :  { %v166_v18 = vadd.f32 %v698_v16, %v165_v17 }
  0xa2   :  { %v169_v19 = vmax.f32 %v166_v18, 0.0 }
  0xa4   :  { %v187_v20 = vpack.c.bf16 %v169_v19, %v169_v19 }
  0xa6   :  { %247 = vmatmul.bf16.vlgmr.msra.gmra.mxu1 %v187_v20 }
  0xa7   :  { %v167_v21 = vpop.f32.mrf.mxu0 }
 0x123   :  { %v248_v31 = vpop.f32.mrf.mxu1 }
 0x124   :  { %v249_v32 = vadd.f32 %v699_v30, %v248_v31 }
 0x126   :  { %v252_v33 = vmax.f32 %v249_v32, 0.0 }
 0x128   :  { %v270_v34 = vpack.c.bf16 %v252_v33, %v252_v33 }
 0x12a   :  { %330 = vmatmul.bf16.vlgmr.msra.gmra.mxu2 %v270_v34 }
 0x12b   :  { %v250_v35 = vpop.f32.mrf.mxu1 }
 0x1ad   :  { %v331_v45 = vpop.f32.mrf.mxu2 }
 0x1ae   :  { %v332_v46 = vadd.f32 %v700_v44, %v331_v45 }
 0x1b0   :  { %v335_v47 = vmax.f32 %v332_v46, 0.0 }
 0x1b2   :  { %v353_v48 = vpack.c.bf16 %v335_v47, %v335_v47 }
 0x1b4   :  { %413 = vmatmul.bf16.vlgmr.msra.gmra.mxu3 %v353_v48 }
 0x1b5   :  { %v333_v49 = vpop.f32.mrf.mxu2 }
 0x237   :  { %v414_v53 = vpop.f32.mrf.mxu3 }
 0x238   :  { %v415_v54 = vadd.f32 %v701_v52, %v414_v53 }
 0x23a   :  { %v418_v55 = vmax.f32 %v415_v54, 0.0 }
 0x23c   :  { %v436_v56 = vpack.c.bf16 %v418_v55, %v418_v55 }
 0x23e   :  { %496 = vmatmul.bf16.vlgmr.msrb.gmra.mxu0 %v436_v56 }
 0x23f   :  { %v416_v57 = vpop.f32.mrf.mxu3 }
 0x2bb   :  { %v497_v59 = vpop.f32.mrf.mxu0 }
 0x2bc   :  { %v498_v60 = vadd.f32 %v702_v58, %v497_v59 }
 0x2be   :  { %501 = vst.msk [vmem:[#allocation14] sm:$0xff] %vm152_vm0, %v498_v60 }
 0x2bf   :  { %512 = dma.vmem_to_hbm [thread:$0]  %s508_s5, 128, %s510_s18, [#allocation4]  }
 0x2c3   :  { %v499_v61 = vpop.f32.mrf.mxu0 }
 0x2c4   :  { %903 = dma.done.wait [#allocation4], 128  }
 0x2c5   :  { %904 = vsyncadd [#allocation4], 4294967168 }
 0x2c6   :  { %517 = vsyncpa [#allocation3], 1 }
 0x2c7   :  { %518 = vsyncpa [#allocation6], 1 }
 0x2c8   :  { %519 = vsyncpa [#allocation9], 1 }
 0x2c9   :  { %520 = vsyncpa [#allocation12], 1 }
 0x2ca   :  { %521 = vsyncpa [#allocation4], 1 }

</bundles_post_ra>
